<compile_context>
chip_gen: v6e
topology: v6e:2x2x1
jax: 0.10.0
libtpu: 0.0.40
codegen_flags: <defaults>
</compile_context>

<pallas_src>
import functools

import jax
import jax.numpy as jnp
from jax.experimental import pallas as pl
from jax.experimental.pallas import tpu as pltpu

N_CLASSES = 5   # len(SUPER_POPULATIONS)
LANE = 128      # TPU lane width


def _round_up(x, m):
    return (x + m - 1) // m * m


# ----------------------------------------------------------------------------------
# Kernel
# ----------------------------------------------------------------------------------
def _population_predictor_kernel(x_ref, w1_ref, wvo_ref, w3_ref, w4t_ref, b_ref,
                                 b4t_ref, out_ref, *, eps):
    f32 = jnp.float32
    hidden = w1_ref.shape[1]
    half_pad = w3_ref.shape[1]
    w_dt = w1_ref.dtype          # f32 (exact path) or bf16 (native-MXU path)

    # Packed bias / LayerNorm rows (one DMA'd (8, W) slab instead of 6 tiny ones).
    b1 = b_ref[0:1, :hidden]
    bvo = b_ref[1:2, :hidden]
    gamma = b_ref[2:3, :hidden]
    beta = b_ref[3:4, :hidden]
    b3 = b_ref[4:5, :half_pad]

    # dense1: Linear + ReLU  (Dropout == identity at inference).
    # Activations are cast to the stored weight dtype so no per-step weight upcast.
    h = jnp.dot(x_ref[...].astype(w_dt), w1_ref[...], preferred_element_type=f32) + b1
    h = jnp.maximum(h, 0.0)

    # MultiheadAttention with seq_len == 1: softmax over a single key == 1, so the
    # attention output is exactly the V projection; V-proj and out_proj were folded
    # offline into (Wvo, bvo).  q/k projections are mathematically dead and omitted.
    a = jnp.dot(h.astype(wvo_ref.dtype), wvo_ref[...], preferred_element_type=f32) + bvo

    # LayerNorm over the hidden dim (biased variance, eps inside rsqrt, affine).
    mean = jnp.mean(a, axis=-1, keepdims=True)
    var = jnp.mean(jnp.square(a - mean), axis=-1, keepdims=True)
    y = (a - mean) * jax.lax.rsqrt(var + eps) * gamma + beta

    # classifier: Linear + ReLU (+ identity Dropout) + Linear.
    c = jnp.dot(y.astype(w_dt), w3_ref[...], preferred_element_type=f32) + b3
    c = jnp.maximum(c, 0.0)

    # Final Linear emitted TRANSPOSED: (n_cls_pad, tb) with batch on the lane axis.
    # This keeps the HBM writeback at 32 B/row instead of a 512 B/row padded slab.
    logits_t = jax.lax.dot_general(
        w4t_ref[...], c.astype(w4t_ref.dtype),
        dimension_numbers=(((1,), (1,)), ((), ())),
        preferred_element_type=f32,
    ) + b4t_ref[...]

    out_ref[...] = logits_t.astype(out_ref.dtype)


# ----------------------------------------------------------------------------------
# Wrapper helpers
# ----------------------------------------------------------------------------------
def _batch_dim_semantics():
    """CORE_PARALLEL shards the batch grid across v7x's two TensorCores; elsewhere the
    plain 'parallel' tag is kept (single-TC v5e/v6e: no codegen effect, no risk)."""
    try:
        kind = jax.devices()[0].device_kind.lower()
    except Exception:
        kind = ""
    if "v7" in kind and hasattr(pltpu, "CORE_PARALLEL"):
        return (pltpu.CORE_PARALLEL,)
    return ("parallel",)


def _choose_batch_tile(B, input_dim, x_itemsize, block_batch):
    """Batch tile: single full tile for small B; otherwise a multiple of 128 so the
    transposed (n_sub, tb) output block is lane-aligned (unmasked vst) and the x block
    sublane-aligned.  Bounded so double-buffered x/out streams stay well inside VMEM
    even for very wide input_dim."""
    if B <= block_batch:
        return _round_up(B, 8), 1
    per_row = _round_up(input_dim, LANE) * x_itemsize + 8 * 4
    max_tb = max(LANE, ((8 << 20) // per_row) // LANE * LANE)
    tb = max(LANE, min(_round_up(block_batch, LANE), max_tb))
    # NOTE(v7x): for best 2-TC balance pick block_batch so the grid length is even.
    return tb, pl.cdiv(B, tb)


def _estimate_vmem_bytes(tb, input_dim, hidden, half_pad, n_sub, x_itemsize,
                         weight_bytes):
    """Rough VMEM footprint: 2x double-buffered x/out tiles + resident weights +
    intermediates, with slack.  Clamped to [8 MiB, 32 MiB] (review: don't reserve
    48 MiB of v7x's 64 MiB for a kernel that needs a few MiB)."""
    pad = lambda d: _round_up(max(int(d), 1), LANE)
    x_tile = tb * pad(input_dim) * x_itemsize
    out_tile = _round_up(n_sub, 8) * pad(tb) * 4
    interm = tb * (3 * pad(hidden) + 2 * pad(half_pad)) * 4   # h, a, y, c (lane-padded)
    est = 2 * (x_tile + out_tile + weight_bytes) + 2 * interm + (4 << 20)
    return int(min(max(est, 8 << 20), 32 << 20))


# ----------------------------------------------------------------------------------
# Wrapper
# ----------------------------------------------------------------------------------
def population_predictor_forward(x, kp, *, n_heads=4, eps=1e-5, block_batch=1024):
    """Fused forward pass.  x: (B, input_dim) float32 or bfloat16 (accepted as-is; do
    NOT pre-cast in the caller — the kernel upcasts on-chip).  Returns (B, 5) float32
    logits.  `kp` is the packed/folded parameter dict from `pack_params`.  `n_heads`
    is kept for API parity; with seq_len == 1 it cannot affect the result."""
    del n_heads
    B, input_dim = x.shape
    n_classes = kp["n_classes"]
    n_sub = kp["w4t"].shape[0]            # classes padded to a sublane multiple (5 -> 8)
    hidden = kp["w1"].shape[1]
    half_pad = kp["w3"].shape[1]

    tb, grid_b = _choose_batch_tile(B, input_dim, x.dtype.itemsize, block_batch)
    b_pad = grid_b * tb
    if b_pad != B:
        x = jnp.pad(x, ((0, b_pad - B), (0, 0)))

    weight_bytes = sum(int(kp[k].size) * kp[k].dtype.itemsize
                       for k in ("w1", "wvo", "w3", "w4t", "biases", "b4t"))
    vmem_limit = _estimate_vmem_bytes(tb, input_dim, hidden, half_pad, n_sub,
                                      x.dtype.itemsize, weight_bytes)

    kernel = functools.partial(_population_predictor_kernel, eps=eps)

    def resident(arr):   # weights/biases: same block every step -> stay VMEM-resident
        return pl.BlockSpec(arr.shape, lambda i: (0, 0))

    out = pl.pallas_call(
        kernel,
        out_shape=jax.ShapeDtypeStruct((n_sub, b_pad), jnp.float32),
        grid=(grid_b,),
        in_specs=[
            pl.BlockSpec((tb, input_dim), lambda i: (i, 0)),   # x: tiled over batch
            resident(kp["w1"]),
            resident(kp["wvo"]),
            resident(kp["w3"]),
            resident(kp["w4t"]),
            resident(kp["biases"]),
            resident(kp["b4t"]),
        ],
        # Transposed output: classes on sublanes, batch on lanes -> 32 B/row writeback.
        out_specs=pl.BlockSpec((n_sub, tb), lambda i: (0, i)),
        compiler_params=pltpu.CompilerParams(
            dimension_semantics=_batch_dim_semantics(),
            vmem_limit_bytes=vmem_limit,
        ),
    )(x, kp["w1"], kp["wvo"], kp["w3"], kp["w4t"], kp["biases"], kp["b4t"])

    return out[:n_classes, :B].T


# ----------------------------------------------------------------------------------
# Parameter construction / packing
# ----------------------------------------------------------------------------------
def init_params(key, input_dim, hidden_dim, *, weight_dtype=jnp.float32):
    """Parameters matching the PyTorch module's shapes (weights stored (in, out), the
    transpose of nn.Linear's (out, in), so the kernel computes x @ W + b directly).

    weight_dtype=float32 (default) keeps the kernel bit-comparable to the f32
    reference; weight_dtype=bfloat16 feeds native bf16 operands to the v6e/v7x MXU
    (activations are downcast at the dot inputs) at a small accuracy cost.
    Wq/Wk/bq/bk exist in the module but are mathematically dead for seq_len == 1, so
    they are not created here."""
    ks = jax.random.split(key, 16)
    half = hidden_dim // 2
    s = 0.05

    def w(k, shape, dtype):
        return (s * jax.random.normal(k, shape)).astype(dtype)

    return {
        # dense1
        "w1": w(ks[0], (input_dim, hidden_dim), weight_dtype),
        "b1": w(ks[1], (1, hidden_dim), jnp.float32),
        # MHA V projection + out_proj (q/k omitted: softmax over one key == identity)
        "wv": w(ks[2], (hidden_dim, hidden_dim), weight_dtype),
        "bv": w(ks[3], (1, hidden_dim), jnp.float32),
        "wo": w(ks[4], (hidden_dim, hidden_dim), weight_dtype),
        "bo": w(ks[5], (1, hidden_dim), jnp.float32),
        # LayerNorm
        "gamma": jnp.ones((1, hidden_dim), jnp.float32),
        "beta": jnp.zeros((1, hidden_dim), jnp.float32),
        # classifier
        "w3": w(ks[6], (hidden_dim, half), weight_dtype),
        "b3": w(ks[7], (1, half), jnp.float32),
        "w4": w(ks[8], (half, N_CLASSES), weight_dtype),
        "b4": w(ks[9], (1, N_CLASSES), jnp.float32),
    }


def pack_params(params, *, n_classes=N_CLASSES):
    """One-time offline prep: fold Wv@Wo, zero-pad the classifier inner dim to 128
    lanes, store W4 pre-transposed (classes on sublanes) for the narrow transposed
    output, and pack all (1, dim) vectors into a single (8, W) slab (one DMA)."""
    f32 = jnp.float32
    hidden = params["w1"].shape[1]
    half = params["w3"].shape[1]
    wdtype = params["w1"].dtype

    # Fold V projection + out_proj (exact: attention == identity for seq_len == 1).
    wv = params["wv"].astype(f32)
    wo = params["wo"].astype(f32)
    wvo = (wv @ wo).astype(wdtype)            # fold computed in f32
    bvo = params["bv"].astype(f32) @ wo + params["bo"].astype(f32)

    half_pad = _round_up(half, LANE)
    n_sub = _round_up(n_classes, 8)           # 5 classes -> 8 sublanes (not 128 lanes)

    w3p = jnp.zeros((hidden, half_pad), wdtype).at[:, :half].set(params["w3"])
    w4t = jnp.zeros((n_sub, half_pad), wdtype).at[:n_classes, :half].set(
        params["w4"].astype(wdtype).T)
    b4t = jnp.zeros((n_sub, 1), f32).at[:n_classes, 0].set(params["b4"].astype(f32)[0])

    bw = max(hidden, half_pad)
    biases = jnp.zeros((8, bw), f32)
    biases = biases.at[0, :hidden].set(params["b1"].astype(f32)[0])
    biases = biases.at[1, :hidden].set(bvo[0])
    biases = biases.at[2, :hidden].set(params["gamma"].astype(f32)[0])
    biases = biases.at[3, :hidden].set(params["beta"].astype(f32)[0])
    biases = biases.at[4, :half].set(params["b3"].astype(f32)[0])

    return {"w1": params["w1"], "wvo": wvo, "w3": w3p, "w4t": w4t,
            "biases": biases, "b4t": b4t, "n_classes": n_classes}


# ----------------------------------------------------------------------------------
# Pure-JAX reference (mirrors the PyTorch module in eval mode, unfolded / unpadded)
# ----------------------------------------------------------------------------------
def reference_forward(x, p, eps=1e-5):
    f32 = jnp.float32
    h = jnp.maximum(x @ p["w1"].astype(f32) + p["b1"], 0.0)
    v = h @ p["wv"].astype(f32) + p["bv"]     # seq_len==1 -> attention output == V
    a = v @ p["wo"].astype(f32) + p["bo"]
    mean = a.mean(-1, keepdims=True)
    var = jnp.square(a - mean).mean(-1, keepdims=True)
    y = (a - mean) / jnp.sqrt(var + eps) * p["gamma"] + p["beta"]
    c = jnp.maximum(y @ p["w3"].astype(f32) + p["b3"], 0.0)
    return c @ p["w4"].astype(f32) + p["b4"]


if __name__ == "__main__":
    batch, input_dim, hidden_dim, n_heads = 20, 64, 32, 4

    key = jax.random.PRNGKey(0)
    k_x, k_p, k_x2 = jax.random.split(key, 3)
    x = jax.random.normal(k_x, (batch, input_dim), dtype=jnp.float32)

    # --- Exact path: f32 weights & activations, single batch tile -------------------
    params = init_params(k_p, input_dim, hidden_dim)          # f32 weights (default)
    packed = pack_params(params)
    logits = population_predictor_forward(x, packed, n_heads=n_heads)
    logits = jax.block_until_ready(logits)
    ref = reference_forward(x, params)
    assert logits.shape == (batch, N_CLASSES)
    assert jnp.allclose(logits, ref, atol=1e-4, rtol=1e-4), "mismatch vs reference"

    # --- Multi-tile path: grid of 3 batch tiles, batch padding, resident weights ----
    x_big = jax.random.normal(k_x2, (300, input_dim), dtype=jnp.float32)
    logits_big = jax.block_until_ready(
        population_predictor_forward(x_big, packed, block_batch=128))
    ref_big = reference_forward(x_big, params)
    assert logits_big.shape == (300, N_CLASSES)
    assert jnp.allclose(logits_big, ref_big, atol=1e-4, rtol=1e-4), "mismatch (tiled)"

    # --- Native-MXU path (v6e/v7x): bf16 weight operands, relaxed tolerance ---------
    params_bf = init_params(k_p, input_dim, hidden_dim, weight_dtype=jnp.bfloat16)
    packed_bf = pack_params(params_bf)
    logits_bf = jax.block_until_ready(
        population_predictor_forward(x, packed_bf, n_heads=n_heads))
    ref_bf = reference_forward(x, params_bf)
    assert jnp.allclose(logits_bf, ref_bf, atol=5e-2, rtol=5e-2), "mismatch (bf16 path)"

    print("KERNEL_OK")
</pallas_src>

<mosaic_0001>
module attributes {stable_mosaic.version = 11 : i64} {
  func.func @_population_predictor_kernel(%arg0: i32, %arg1: memref<24x64xf32, #tpu.memory_space<vmem>>, %arg2: memref<64x32xf32, #tpu.memory_space<vmem>>, %arg3: memref<32x32xf32, #tpu.memory_space<vmem>>, %arg4: memref<32x128xf32, #tpu.memory_space<vmem>>, %arg5: memref<8x128xf32, #tpu.memory_space<vmem>>, %arg6: memref<8x128xf32, #tpu.memory_space<vmem>>, %arg7: memref<8x1xf32, #tpu.memory_space<vmem>>, %arg8: memref<8x24xf32, #tpu.memory_space<vmem>>) attributes {dimension_semantics = [#tpu.dimension_semantics<parallel>], iteration_bounds = array<i64: 1>, scalar_prefetch = 0 : i64, scratch_operands = 0 : i64, tpu.core_type = #tpu.core_type<tc>, window_params = [{transform_indices = @transform_0, window_bounds = array<i64: 24, 64>}, {pipeline_mode = #tpu.pipeline_mode<synchronous>, transform_indices = @transform_1, window_bounds = array<i64: 64, 32>}, {pipeline_mode = #tpu.pipeline_mode<synchronous>, transform_indices = @transform_2, window_bounds = array<i64: 32, 32>}, {pipeline_mode = #tpu.pipeline_mode<synchronous>, transform_indices = @transform_3, window_bounds = array<i64: 32, 128>}, {pipeline_mode = #tpu.pipeline_mode<synchronous>, transform_indices = @transform_4, window_bounds = array<i64: 8, 128>}, {pipeline_mode = #tpu.pipeline_mode<synchronous>, transform_indices = @transform_5, window_bounds = array<i64: 8, 128>}, {pipeline_mode = #tpu.pipeline_mode<synchronous>, transform_indices = @transform_6, window_bounds = array<i64: 8, 1>}, {transform_indices = @transform_7, window_bounds = array<i64: 8, 24>}]} {
    %c0 = arith.constant 0 : index
    %c0_0 = arith.constant 0 : index
    %0 = vector.load %arg6[%c0, %c0_0] : memref<8x128xf32, #tpu.memory_space<vmem>>, vector<1x32xf32>
    %c1 = arith.constant 1 : index
    %c0_1 = arith.constant 0 : index
    %1 = vector.load %arg6[%c1, %c0_1] : memref<8x128xf32, #tpu.memory_space<vmem>>, vector<1x32xf32>
    %c2 = arith.constant 2 : index
    %c0_2 = arith.constant 0 : index
    %2 = vector.load %arg6[%c2, %c0_2] : memref<8x128xf32, #tpu.memory_space<vmem>>, vector<1x32xf32>
    %c3 = arith.constant 3 : index
    %c0_3 = arith.constant 0 : index
    %3 = vector.load %arg6[%c3, %c0_3] : memref<8x128xf32, #tpu.memory_space<vmem>>, vector<1x32xf32>
    %c4 = arith.constant 4 : index
    %c0_4 = arith.constant 0 : index
    %4 = vector.load %arg6[%c4, %c0_4] : memref<8x128xf32, #tpu.memory_space<vmem>>, vector<1x128xf32>
    %c0_5 = arith.constant 0 : index
    %c0_6 = arith.constant 0 : index
    %5 = vector.load %arg1[%c0_5, %c0_6] : memref<24x64xf32, #tpu.memory_space<vmem>>, vector<24x64xf32>
    %c0_7 = arith.constant 0 : index
    %c0_8 = arith.constant 0 : index
    %6 = vector.load %arg2[%c0_7, %c0_8] : memref<64x32xf32, #tpu.memory_space<vmem>>, vector<64x32xf32>
    %cst = arith.constant dense<0.000000e+00> : vector<24x32xf32>
    %7 = tpu.matmul %5, %6, %cst {dimension_numbers = #tpu.dot_dimension_numbers<[1], [0], [0], [1], [0, 0, 1, 1], [], []>} : vector<24x64xf32>, vector<64x32xf32>, vector<24x32xf32> -> vector<24x32xf32>
    %8 = vector.broadcast %0 : vector<1x32xf32> to vector<24x32xf32>
    %9 = arith.addf %7, %8 : vector<24x32xf32>
    %cst_9 = arith.constant 0.000000e+00 : f32
    %10 = vector.broadcast %cst_9 : f32 to vector<24x32xf32>
    %11 = arith.maximumf %9, %10 : vector<24x32xf32>
    %c0_10 = arith.constant 0 : index
    %c0_11 = arith.constant 0 : index
    %12 = vector.load %arg3[%c0_10, %c0_11] : memref<32x32xf32, #tpu.memory_space<vmem>>, vector<32x32xf32>
    %cst_12 = arith.constant dense<0.000000e+00> : vector<24x32xf32>
    %13 = tpu.matmul %11, %12, %cst_12 {dimension_numbers = #tpu.dot_dimension_numbers<[1], [0], [0], [1], [0, 0, 1, 1], [], []>} : vector<24x32xf32>, vector<32x32xf32>, vector<24x32xf32> -> vector<24x32xf32>
    %14 = vector.broadcast %1 : vector<1x32xf32> to vector<24x32xf32>
    %15 = arith.addf %13, %14 : vector<24x32xf32>
    %cst_13 = arith.constant dense<0.000000e+00> : vector<24xf32>
    %16 = vector.multi_reduction <add>, %15, %cst_13 [1] : vector<24x32xf32> to vector<24xf32>
    %17 = vector.shape_cast %16 : vector<24xf32> to vector<24x1xf32>
    %cst_14 = arith.constant 3.200000e+01 : f32
    %18 = vector.broadcast %cst_14 : f32 to vector<24x1xf32>
    %19 = arith.divf %17, %18 : vector<24x1xf32>
    %20 = vector.broadcast %19 : vector<24x1xf32> to vector<24x32xf32>
    %21 = arith.subf %15, %20 : vector<24x32xf32>
    %22 = arith.mulf %21, %21 : vector<24x32xf32>
    %cst_15 = arith.constant dense<0.000000e+00> : vector<24xf32>
    %23 = vector.multi_reduction <add>, %22, %cst_15 [1] : vector<24x32xf32> to vector<24xf32>
    %24 = vector.shape_cast %23 : vector<24xf32> to vector<24x1xf32>
    %cst_16 = arith.constant 3.200000e+01 : f32
    %25 = vector.broadcast %cst_16 : f32 to vector<24x1xf32>
    %26 = arith.divf %24, %25 : vector<24x1xf32>
    %27 = vector.broadcast %19 : vector<24x1xf32> to vector<24x32xf32>
    %28 = arith.subf %15, %27 : vector<24x32xf32>
    %cst_17 = arith.constant 9.99999974E-6 : f32
    %29 = vector.broadcast %cst_17 : f32 to vector<24x1xf32>
    %30 = arith.addf %26, %29 : vector<24x1xf32>
    %31 = math.rsqrt %30 : vector<24x1xf32>
    %32 = vector.broadcast %31 : vector<24x1xf32> to vector<24x32xf32>
    %33 = arith.mulf %28, %32 : vector<24x32xf32>
    %34 = vector.broadcast %2 : vector<1x32xf32> to vector<24x32xf32>
    %35 = arith.mulf %33, %34 : vector<24x32xf32>
    %36 = vector.broadcast %3 : vector<1x32xf32> to vector<24x32xf32>
    %37 = arith.addf %35, %36 : vector<24x32xf32>
    %c0_18 = arith.constant 0 : index
    %c0_19 = arith.constant 0 : index
    %38 = vector.load %arg4[%c0_18, %c0_19] : memref<32x128xf32, #tpu.memory_space<vmem>>, vector<32x128xf32>
    %cst_20 = arith.constant dense<0.000000e+00> : vector<24x128xf32>
    %39 = tpu.matmul %37, %38, %cst_20 {dimension_numbers = #tpu.dot_dimension_numbers<[1], [0], [0], [1], [0, 0, 1, 1], [], []>} : vector<24x32xf32>, vector<32x128xf32>, vector<24x128xf32> -> vector<24x128xf32>
    %40 = vector.broadcast %4 : vector<1x128xf32> to vector<24x128xf32>
    %41 = arith.addf %39, %40 : vector<24x128xf32>
    %cst_21 = arith.constant 0.000000e+00 : f32
    %42 = vector.broadcast %cst_21 : f32 to vector<24x128xf32>
    %43 = arith.maximumf %41, %42 : vector<24x128xf32>
    %c0_22 = arith.constant 0 : index
    %c0_23 = arith.constant 0 : index
    %44 = vector.load %arg5[%c0_22, %c0_23] : memref<8x128xf32, #tpu.memory_space<vmem>>, vector<8x128xf32>
    %cst_24 = arith.constant dense<0.000000e+00> : vector<8x24xf32>
    %45 = tpu.matmul %44, %43, %cst_24 {dimension_numbers = #tpu.dot_dimension_numbers<[1], [1], [0], [0], [0, 0, 1, 0], [], []>} : vector<8x128xf32>, vector<24x128xf32>, vector<8x24xf32> -> vector<8x24xf32>
    %c0_25 = arith.constant 0 : index
    %c0_26 = arith.constant 0 : index
    %46 = vector.load %arg7[%c0_25, %c0_26] : memref<8x1xf32, #tpu.memory_space<vmem>>, vector<8x1xf32>
    %47 = vector.broadcast %46 : vector<8x1xf32> to vector<8x24xf32>
    %48 = arith.addf %45, %47 : vector<8x24xf32>
    %c0_27 = arith.constant 0 : index
    %c0_28 = arith.constant 0 : index
    %49 = vector.load %arg8[%c0_27, %c0_28] : memref<8x24xf32, #tpu.memory_space<vmem>>, vector<8x24xf32>
    tpu.vector_store %arg8[%c0_27, %c0_28], %48 {strides = array<i32>} : memref<8x24xf32, #tpu.memory_space<vmem>>, vector<8x24xf32>,
    return
  }
  func.func @transform_0(%arg0: i32) -> (i32, i32) {
    %c0_i32 = arith.constant 0 : i32
    %c0_i32_0 = arith.constant 0 : i32
    return %arg0, %c0_i32 : i32, i32
  }
  func.func @transform_1(%arg0: i32) -> (i32, i32) {
    %c0_i32 = arith.constant 0 : i32
    %c0_i32_0 = arith.constant 0 : i32
    %c0_i32_1 = arith.constant 0 : i32
    return %c0_i32, %c0_i32_0 : i32, i32
  }
  func.func @transform_2(%arg0: i32) -> (i32, i32) {
    %c0_i32 = arith.constant 0 : i32
    %c0_i32_0 = arith.constant 0 : i32
    %c0_i32_1 = arith.constant 0 : i32
    return %c0_i32, %c0_i32_0 : i32, i32
  }
  func.func @transform_3(%arg0: i32) -> (i32, i32) {
    %c0_i32 = arith.constant 0 : i32
    %c0_i32_0 = arith.constant 0 : i32
    %c0_i32_1 = arith.constant 0 : i32
    return %c0_i32, %c0_i32_0 : i32, i32
  }
  func.func @transform_4(%arg0: i32) -> (i32, i32) {
    %c0_i32 = arith.constant 0 : i32
    %c0_i32_0 = arith.constant 0 : i32
    %c0_i32_1 = arith.constant 0 : i32
    return %c0_i32, %c0_i32_0 : i32, i32
  }
  func.func @transform_5(%arg0: i32) -> (i32, i32) {
    %c0_i32 = arith.constant 0 : i32
    %c0_i32_0 = arith.constant 0 : i32
    %c0_i32_1 = arith.constant 0 : i32
    return %c0_i32, %c0_i32_0 : i32, i32
  }
  func.func @transform_6(%arg0: i32) -> (i32, i32) {
    %c0_i32 = arith.constant 0 : i32
    %c0_i32_0 = arith.constant 0 : i32
    %c0_i32_1 = arith.constant 0 : i32
    return %c0_i32, %c0_i32_0 : i32, i32
  }
  func.func @transform_7(%arg0: i32) -> (i32, i32) {
    %c0_i32 = arith.constant 0 : i32
    %c0_i32_0 = arith.constant 0 : i32
    return %c0_i32, %arg0 : i32, i32
  }
}

</mosaic_0001>

<bundles_post_ra>
// kernel: tpu_custom_call.1
= control target key start
LH: loop header
LB: loop body
LE: loop exit
PB: predicated region body
PF: predicated region fallthrough
CT: control target
= control target key end

     0   :  { %v629_v1 = vmov 0.0   ;;  %vm630_vm0 = vmmov 0   ;;  %s805_s0 = inlined_call_operand.vmem [shape: f32[24,64], index: 0, kind: input, shape index: {}]   ;;  %s806_s1 = inlined_call_operand.vmem [shape: f32[64,32], index: 1, kind: input, shape index: {}]   ;;  %s807_s2 = inlined_call_operand.vmem [shape: f32[32,32], index: 2, kind: input, shape index: {}]   ;;  %s808_s3 = inlined_call_operand.vmem [shape: f32[32,128], index: 3, kind: input, shape index: {}]   ;;  %s809_s4 = inlined_call_operand.vmem [shape: f32[8,128], index: 4, kind: input, shape index: {}]   ;;  %s810_s5 = inlined_call_operand.vmem [shape: f32[8,128], index: 5, kind: input, shape index: {}]   ;;  %s811_s6 = inlined_call_operand.vmem [shape: f32[8,1], index: 6, kind: input, shape index: {}]   ;;  %s812_s7 = inlined_call_operand.hbm [shape: f32[8,24], index: 7, kind: output, shape index: {}]  }
   0x1   :  { %v42_v0 = vld [vmem:[%s806_s1 + $0x38] sm:$0xff]  ;;  %528 = vmatprep.subr.mxu0 %v629_v1  ;;  %v41_v2 = vld [vmem:[%s806_s1 + $0x30] sm:$0xff]  ;;  %544 = vmatprep.mubr.msk.f32.mxu0 %vm630_vm0, %v629_v1  ;;  %v40_v3 = vld [vmem:[%s806_s1 + $0x28] sm:$0xff] }
   0x2   :  { %529 = vmatpush3.msra.mxu0 %v42_v0  ;;  %553 = vmatprep.subr.mxu1 %v629_v1  ;;  %v143_v4 = vld [vmem:[%s807_s2 + $0x18] sm:$0xff] }
   0x3   :  { %530 = vmatprep.subr.mxu0 %v629_v1  ;;  %561 = vmatprep.mubr.msk.f32.mxu1 %vm630_vm0, %v629_v1 }
   0x4   :  { %531 = vmatpush3.msra.mxu0 %v41_v2  ;;  %554 = vmatpush3.msra.mxu1 %v143_v4 }
   0x5   :  { %12 = vsyncpa [#allocation3], 0  ;;  %532 = vmatprep.subr.mxu0 %v629_v1  ;;  %v39_v5 = vld [vmem:[%s806_s1 + $0x20] sm:$0xff]  ;;  %555 = vmatprep.subr.mxu1 %v629_v1  ;;  %v38_v6 = vld [vmem:[%s806_s1 + $0x18] sm:$0xff]  ;;  %vm47_vm1 = vcmask 523264   ;;  %vm148_vm2 = vcmask 261120  }
   0x6   :  { %533 = vmatpush3.msra.mxu0 %v40_v3  ;;  %v37_v7 = vld [vmem:[%s806_s1 + $0x10] sm:$0xff]  ;;  %v36_v8 = vld [vmem:[%s806_s1 + $0x8] sm:$0xff]  ;;  %v35_v9 = vld [vmem:[%s806_s1] sm:$0xff]  ;;  %vm469_vm3 = vcmask 195584  }
   0x7   :  { %534 = vmatprep.subr.mxu0 %v629_v1  ;;  %v32_v10 = vld [vmem:[%s805_s0] sm:$0xff]  ;;  %v33_v11 = vld [vmem:[%s805_s0 + $0x8] sm:$0xff]  ;;  %v34_v12 = vld [vmem:[%s805_s0 + $0x10] sm:$0xff] }
   0x8   :  { %535 = vmatpush3.msra.mxu0 %v39_v5  ;;  %v142_v13 = vld [vmem:[%s807_s2 + $0x10] sm:$0xff]  ;;  %v141_v14 = vld [vmem:[%s807_s2 + $0x8] sm:$0xff]  ;;  %v140_v15 = vld [vmem:[%s807_s2] sm:$0xff] }
   0x9   :  { %536 = vmatprep.subr.mxu0 %v629_v1  ;;  %556 = vmatpush3.msra.mxu1 %v142_v13  ;;  %v485_v16 = vld [vmem:[%s810_s5] ss:$0 sm:$0xff]  ;;  %v489_v29 = vld [vmem:[%s810_s5 + $0x1] ss:$0 sm:$0xff]  ;;  %v295_v57 = vld [vmem:[%s808_s3 + $0x18] sm:$0xff] }
   0xa   :  { %537 = vmatpush3.msra.mxu0 %v38_v6  ;;  %557 = vmatprep.subr.mxu1 %v629_v1  ;;  %v294_v58 = vld [vmem:[%s808_s3 + $0x10] sm:$0xff]  ;;  %v293_v59 = vld [vmem:[%s808_s3 + $0x8] sm:$0xff]  ;;  %v292_v60 = vld [vmem:[%s808_s3] sm:$0xff] }
   0xb   :  { %538 = vmatprep.subr.mxu0 %v629_v1  ;;  %558 = vmatpush3.msra.mxu1 %v141_v14 }
   0xc   :  { %539 = vmatpush3.msra.mxu0 %v37_v7  ;;  %559 = vmatprep.subr.mxu1 %v629_v1 }
   0xd   :  { %540 = vmatprep.subr.mxu0 %v629_v1  ;;  %560 = vmatpush3.msra.mxu1 %v140_v15 }
   0xe   :  { %541 = vmatpush3.msra.mxu0 %v36_v8  ;;  %570 = vmatprep.subr.mxu1 %v629_v1  ;;  %v493_v8 = vld [vmem:[%s810_s5 + $0x2] ss:$0 sm:$0xff] }
   0xf   :  { %542 = vmatprep.subr.mxu0 %v629_v1 }
  0x10   :  { %543 = vmatpush3.msra.mxu0 %v35_v9 }
  0x11   :  { %545 = vmatmul.mubr.msk.f32.vlgmr.msra.gmra.mxu0 %vm47_vm1, %v32_v10  ;;  %587 = vmatprep.subr.mxu0 %v629_v1  ;;  %v494_v10 = vld [vmem:[%s810_s5 + $0x3] ss:$0 sm:$0xff] }
  0x12   :  { %547 = vmatprep.mubr.msk.f32.mxu0 %vm630_vm0, %v629_v1 }
  0x15   :  { %548 = vmatmul.mubr.msk.f32.gmra.mxu0 %vm47_vm1, %v33_v11 }
  0x16   :  { %550 = vmatprep.mubr.msk.f32.mxu0 %vm630_vm0, %v629_v1 }
  0x19   :  { %551 = vmatmul.mubr.msk.f32.gmra.mxu0 %vm47_vm1, %v34_v12 }
  0x1a   :  { %593 = vmatprep.mubr.msk.f32.mxu0 %vm630_vm0, %v629_v1 }
  0xd1   :  { %v123_v17 = vpop.f32.mrf.mxu0 }
  0xd2   :  { %v124_v18 = vadd.f32 %v485_v16, %v123_v17 }
  0xd3   :  { %v546_v19 = vpop.f32.mrf.mxu0 }
  0xd4   :  { %v137_v20 = vmax.f32 %v124_v18, 0.0 }
  0xd5   :  { %v128_v21 = vpop.f32.mrf.mxu0 }
  0xd6   :  { %v129_v22 = vadd.f32 %v485_v16, %v128_v21  ;;  %562 = vmatmul.mubr.msk.f32.vlgmr.msra.gmra.mxu1 %vm148_vm2, %v137_v20  ;;  %v393_v21 = vld [vmem:[%s811_s6] sm:$0xff] }
  0xd7   :  { %v549_v23 = vpop.f32.mrf.mxu0  ;;  %564 = vmatprep.mubr.msk.f32.mxu1 %vm630_vm0, %v629_v1  ;;  %571 = vmatpush3.msra.mxu1 %v295_v57 }
  0xd8   :  { %v138_v24 = vmax.f32 %v129_v22, 0.0  ;;  %572 = vmatprep.subr.mxu1 %v629_v1  ;;  %v631_v22 = vmov 0  }
  0xd9   :  { %v133_v25 = vpop.f32.mrf.mxu0  ;;  %573 = vmatpush3.msra.mxu1 %v294_v58  ;;  %600 = vset.pattern.permute.xlu0 %v631_v22 }
  0xda   :  { %v134_v26 = vadd.f32 %v485_v16, %v133_v25  ;;  %565 = vmatmul.mubr.msk.f32.gmra.mxu1 %vm148_vm2, %v138_v24  ;;  %574 = vmatprep.subr.mxu1 %v629_v1 }
  0xdb   :  { %v552_v27 = vpop.f32.mrf.mxu0  ;;  %567 = vmatprep.mubr.msk.f32.mxu1 %vm630_vm0, %v629_v1  ;;  %575 = vmatpush3.msra.mxu1 %v293_v59 }
  0xdc   :  { %v139_v28 = vmax.f32 %v134_v26, 0.0  ;;  %576 = vmatprep.subr.mxu1 %v629_v1  ;;  %v495_v27 = vld [vmem:[%s810_s5 + $0x4] ss:$0 sm:$0xff]  ;;  %s632_s5 = smov [#allocation2]  }
  0xdd   :  { %577 = vmatpush3.msra.mxu1 %v292_v60  ;;  %s477_s24 = sshll.u32 %s632_s5, 4  ;;  %s478_s24 = int_to_ptr.vmem [resolvable:$true] %s477_s24 }
  0xde   :  { %568 = vmatmul.mubr.msk.f32.gmra.mxu1 %vm148_vm2, %v139_v28  ;;  %s607_s25 = scalar_lea.vmem %s478_s24, 128  ;;  %p612_p1 = scmp.lt.s32.totalorder %s478_s24, %s478_s24 }
  0xdf   :  { %578 = vmatprep.mubr.msk.f32.mxu1 %vm630_vm0, %v629_v1  ;;  %p608_p0 = scmp.ne.s32.totalorder %s478_s24, %s607_s25  ;;  %p613_p2 = scmp.lt.s32.totalorder %s607_s25, %s607_s25 }
  0xe1   :  { %p614_p3 = por %p613_p2, %p612_p1 }
  0xe3   :  { %p615_p4 = pnand %p614_p3, %p608_p0 }
 0x196   :  { %v224_v30 = vpop.f32.mrf.mxu1 }
 0x197   :  { %v225_v31 = vadd.f32 %v489_v29, %v224_v30 }
 0x198   :  { %v563_v32 = vpop.f32.mrf.mxu1 }
 0x199   :  { %v238_v33 = vsel %vm148_vm2, %v225_v31, 0.0 }
 0x19a   :  { %239 = vadd.xlane.f32.xlu0 %v238_v33  ;;  %v229_v34 = vpop.f32.mrf.mxu1 }
 0x19b   :  { %v230_v35 = vadd.f32 %v489_v29, %v229_v34 }
 0x19c   :  { %v566_v36 = vpop.f32.mrf.mxu1 }
 0x19d   :  { %v241_v37 = vsel %vm148_vm2, %v230_v35, 0.0  ;;  %v392_v36 = vld [vmem:[%s809_s4] sm:$0xff] }
 0x19e   :  { %242 = vadd.xlane.f32.xlu0 %v241_v37  ;;  %v234_v38 = vpop.f32.mrf.mxu1 }
 0x19f   :  { %v235_v39 = vadd.f32 %v489_v29, %v234_v38 }
 0x1a0   :  { %v569_v40 = vpop.f32.mrf.mxu1 }
 0x1a1   :  { %v244_v41 = vsel %vm148_vm2, %v235_v39, 0.0 }
 0x1a2   :  { %245 = vadd.xlane.f32.xlu1 %v244_v41 }
 0x223   :  { %v240_v42 = vpop.xlane.xlu0 %239 }
 0x224   :  { %v248_v43 = vmul.f32 0.03125, %v240_v42 }
 0x226   :  { %v251_v44 = vsub.f32 %v225_v31, %v248_v43 }
 0x227   :  { %v243_v45 = vpop.xlane.xlu0 %242 }
 0x228   :  { %v249_v46 = vmul.f32 0.03125, %v243_v45  ;;  %v254_v47 = vmul.f32 %v251_v44, %v251_v44 }
 0x22a   :  { %v252_v48 = vsub.f32 %v230_v35, %v249_v46  ;;  %v257_v49 = vsel %vm148_vm2, %v254_v47, 0.0 }
 0x22b   :  { %258 = vadd.xlane.f32.xlu1 %v257_v49  ;;  %v246_v50 = vpop.xlane.xlu1 %245 }
 0x22c   :  { %v250_v51 = vmul.f32 0.03125, %v246_v50  ;;  %v255_v52 = vmul.f32 %v252_v48, %v252_v48 }
 0x22e   :  { %v253_v53 = vsub.f32 %v235_v39, %v250_v51  ;;  %v260_v54 = vsel %vm148_vm2, %v255_v52, 0.0 }
 0x22f   :  { %261 = vadd.xlane.f32.xlu0 %v260_v54 }
 0x230   :  { %v256_v55 = vmul.f32 %v253_v53, %v253_v53 }
 0x232   :  { %v263_v56 = vsel %vm148_vm2, %v256_v55, 0.0 }
 0x233   :  { %264 = vadd.xlane.f32.xlu1 %v263_v56 }
 0x245   :  { %396 = vperm.xlu0 %600, %v393_v21  }
 0x2b4   :  { %v259_v61 = vpop.xlane.xlu1 %258 }
 0x2b5   :  { %v266_v62 = vmul.f32 0.03125, %v259_v61 }
 0x2b7   :  { %v269_v63 = vadd.f32 1e-05, %v266_v62 }
 0x2b8   :  { %v262_v0 = vpop.xlane.xlu0 %261 }
 0x2b9   :  { %601 = vrsqrt.f32 %v269_v63  ;;  %v267_v2 = vmul.f32 0.03125, %v262_v0 }
 0x2bb   :  { %v270_v3 = vadd.f32 1e-05, %v267_v2 }
 0x2bc   :  { %v265_v4 = vpop.xlane.xlu1 %264 }
 0x2bd   :  { %603 = vrsqrt.f32 %v270_v3  ;;  %v268_v5 = vmul.f32 0.03125, %v265_v4 }
 0x2bf   :  { %v271_v6 = vadd.f32 1e-05, %v268_v5 }
 0x2c0   :  { %v397_v37 = vpop.permute.xlu0 %396 }
 0x2c1   :  { %605 = vrsqrt.f32 %v271_v6 }
 0x2c6   :  { %v602_v7 = vpop.eup %601 }
 0x2c7   :  { %v275_v9 = vmul.f32 %v602_v7, %v251_v44 }
 0x2c9   :  { %v282_v11 = vmul.f32 %v493_v8, %v275_v9 }
 0x2ca   :  { %v604_v12 = vpop.eup %603 }
 0x2cb   :  { %v289_v13 = vadd.f32 %v494_v10, %v282_v11  ;;  %v276_v14 = vmul.f32 %v604_v12, %v252_v48 }
 0x2cd   :  { %579 = vmatmul.mubr.msk.f32.vlgmr.msra.gmra.mxu1 %vm148_vm2, %v289_v13  ;;  %v283_v15 = vmul.f32 %v493_v8, %v276_v14 }
 0x2ce   :  { %v606_v16 = vpop.eup %605  ;;  %581 = vmatprep.mubr.msk.f32.mxu1 %vm630_vm0, %v629_v1 }
 0x2cf   :  { %v290_v17 = vadd.f32 %v494_v10, %v283_v15  ;;  %v277_v18 = vmul.f32 %v606_v16, %v253_v53 }
 0x2d1   :  { %582 = vmatmul.mubr.msk.f32.gmra.mxu1 %vm148_vm2, %v290_v17  ;;  %v284_v19 = vmul.f32 %v493_v8, %v277_v18 }
 0x2d2   :  { %584 = vmatprep.mubr.msk.f32.mxu1 %vm630_vm0, %v629_v1 }
 0x2d3   :  { %v291_v20 = vadd.f32 %v494_v10, %v284_v19 }
 0x2d5   :  { %585 = vmatmul.mubr.msk.f32.gmra.mxu1 %vm148_vm2, %v291_v20 }
 0x38d   :  { %v375_v23 = vpop.f32.mrf.mxu1 }
 0x38e   :  { %v376_v33 = vadd.f32 %v495_v27, %v375_v23 }
 0x38f   :  { %v580_v24 = vpop.f32.mrf.mxu1 }
 0x390   :  { %v389_v35 = vmax.f32 %v376_v33, 0.0 }
 0x391   :  { %v380_v25 = vpop.f32.mrf.mxu1 }
 0x392   :  { %v381_v31 = vadd.f32 %v495_v27, %v380_v25 }
 0x393   :  { %v583_v26 = vpop.f32.mrf.mxu1 }
 0x394   :  { %v390_v34 = vmax.f32 %v381_v31, 0.0 }
 0x395   :  { %v385_v28 = vpop.f32.mrf.mxu1 }
 0x396   :  { %v386_v29 = vadd.f32 %v495_v27, %v385_v28 }
 0x397   :  { %v586_v30 = vpop.f32.mrf.mxu1 }
 0x398   :  { %v391_v32 = vmax.f32 %v386_v29, 0.0 }
 0x39a   :  { %588 = vmatpush3.xpose.msra.mxu0 %v391_v32 }
 0x39b   :  { %589 = vmatprep.subr.mxu0 %v629_v1 }
 0x39e   :  { %590 = vmatpush3.xpose.msra.mxu0 %v390_v34 }
 0x39f   :  { %591 = vmatprep.subr.mxu0 %v629_v1 }
 0x3a2   :  { %592 = vmatpush3.xpose.msra.mxu0 %v389_v35 }
 0x3a5   :  { %594 = vmatmul.mubr.f32.vlgmr.msra.gmra.mxu0 %v392_v36 }
 0x465   :  { %v465_v38 = vpop.f32.mrf.mxu0 }
 0x466   :  { %v466_v39 = vadd.f32 %v465_v38, %v397_v37 }
 0x467   :  { %v595_v40 = vpop.f32.mrf.mxu0 }
 0x468   :  { %470 = vst.msk [vmem:[#allocation2] sm:$0xff] %vm469_vm3, %v466_v39 }
 0x469   :  { %618 = shalt.err (!%p615_p4)
}
 0x46a   :  { %480 = dma.vmem_to_hbm [thread:$0]  %s478_s24, 128, %s812_s7, [#allocation3]  }
 0x46b   :  { %627 = dma.done.wait [#allocation3], 128  }
 0x46c   :  { %628 = vsyncadd [#allocation3], 4294967168 }
 0x46d   :  { %484 = vsyncpa [#allocation3], 1 }

</bundles_post_ra>
